<compile_context>
chip_gen: v5e
topology: v5e:2x2
jax: 0.10.0
libtpu: 0.0.40
codegen_flags: <defaults>
</compile_context>

<pallas_src>
import math

import jax
import jax.numpy as jnp
from jax.experimental import pallas as pl
from jax.experimental.pallas import tpu as pltpu


def _round_up(x: int, m: int) -> int:
    return ((x + m - 1) // m) * m


def _vmem_capacity_bytes() -> int:
    try:
        return int(pltpu.get_tpu_info().vmem_capacity_bytes)
    except Exception:
        return 64 * 1024 * 1024  # conservative (v7x per-TC VMEM)


def _pick_dim_tile(dim: int, align: int, cap: int):
    """Return (tile, padded_dim) for one problem dimension.

    Prefers choices that need NO padding:
      * dim <= cap  -> a single full-extent block (tile == dim, always legal
        since a block dim equal to the full array dim satisfies the (8,128)
        rule).
      * otherwise the largest multiple of `align` in (cap/4, cap] that
        divides dim exactly.
    Falls back to tile == cap with dim padded up to a multiple of cap.
    """
    if dim <= cap:
        return dim, dim
    min_t = max(align, cap // 4)
    t = (cap // align) * align
    while t >= min_t:
        if dim % t == 0:
            return t, dim
        t -= align
    return cap, _round_up(dim, cap)


# ---------------------------------------------------------------------------
# Kernels
# ---------------------------------------------------------------------------

def _kernel_single_k(x_ref, wt_ref, b_ref, o_ref):
    # Whole K in one step: no accumulator, no branches.
    acc = jnp.dot(x_ref[...], wt_ref[...], preferred_element_type=jnp.float32)
    o_ref[...] = (acc + b_ref[...].astype(jnp.float32)).astype(o_ref.dtype)


def _kernel_multi_k_f32out(x_ref, wt_ref, b_ref, o_ref):
    # f32 output block is resident across the K axis -> accumulate directly
    # into it (saves the scratch buffer and the finalize copy).
    k = pl.program_id(2)

    @pl.when(k == 0)
    def _init():
        o_ref[...] = jnp.zeros_like(o_ref) + b_ref[...].astype(jnp.float32)

    o_ref[...] += jnp.dot(
        x_ref[...], wt_ref[...], preferred_element_type=jnp.float32
    )


def _kernel_multi_k_acc(x_ref, wt_ref, b_ref, o_ref, acc_ref):
    # Non-f32 outputs (e.g. bf16): keep an f32 VMEM accumulator.
    k = pl.program_id(2)

    @pl.when(k == 0)
    def _init():
        acc_ref[...] = jnp.zeros_like(acc_ref)

    acc_ref[...] += jnp.dot(
        x_ref[...], wt_ref[...], preferred_element_type=jnp.float32
    )

    @pl.when(k == pl.num_programs(2) - 1)
    def _finalize():
        out = acc_ref[...] + b_ref[...].astype(jnp.float32)
        o_ref[...] = out.astype(o_ref.dtype)


# ---------------------------------------------------------------------------
# Wrapper
# ---------------------------------------------------------------------------

def prepare_ga_linear_weight(weight):
    """One-time conversion of an nn.Linear-layout weight (out, in) into the
    lane-dense (in, out) layout consumed by the kernel.  Do this at init (not
    per forward call) to avoid a K*N HBM transpose copy on every call."""
    return jnp.asarray(weight).T


def ga_linear_kn(x, weight_kn, bias=None, *, tile_caps=None):
    """y = x @ W_kn + b, with W_kn already in (in_features, out_features).

    x:         (..., in_features)
    weight_kn: (in_features, out_features)   -- pre-transposed, lane-dense
    bias:      (out_features,) or None
    returns    (..., out_features)
    """
    *lead, K = x.shape
    K_w, N = weight_kn.shape
    assert K == K_w, (K, K_w)
    M = int(math.prod(lead)) if lead else 1

    in_bytes = jnp.dtype(x.dtype).itemsize
    w_bytes = jnp.dtype(weight_kn.dtype).itemsize
    out_dtype = x.dtype
    out_bytes = jnp.dtype(out_dtype).itemsize
    sublane = 16 if in_bytes == 2 else 8

    if tile_caps is None:
        tm_cap, tn_cap = 512, 512
        tk_cap = 2048 if in_bytes == 2 else 1024
    else:
        tm_cap, tn_cap, tk_cap = tile_caps

    tm, Mp = _pick_dim_tile(M, sublane, tm_cap)
    tn, Np = _pick_dim_tile(N, 128, tn_cap)
    tk, Kp = _pick_dim_tile(K, 128, tk_cap)

    # v7x has 2 TensorCores: make sure the parallel (M, N) grid has >= 2 tiles
    # for non-trivial problems so dimension_semantics can shard work.
    if (Mp // tm) * (Np // tn) == 1 and M * N >= 128 * 1024:
        if tn % 256 == 0:
            tn //= 2
        elif tm % (2 * sublane) == 0:
            tm //= 2

    grid_m, grid_n, grid_k = Mp // tm, Np // tn, Kp // tk
    grid = (grid_m, grid_n, grid_k)

    # Padding is only taken on truly ragged shapes (K padding with zeros is
    # the only one required for correctness; M/N padding only happens when no
    # dividing tile exists).
    x2d = x.reshape(M, K)
    if (Mp, Kp) != (M, K):
        x2d = jnp.pad(x2d, ((0, Mp - M), (0, Kp - K)))
    wt = weight_kn
    if (Kp, Np) != (K, N):
        wt = jnp.pad(wt, ((0, Kp - K), (0, Np - N)))
    if bias is None:
        b2d = jnp.zeros((1, Np), out_dtype)
    else:
        b2d = bias.reshape(1, N)
        if Np != N:
            b2d = jnp.pad(b2d, ((0, 0), (0, Np - N)))

    in_specs = [
        pl.BlockSpec((tm, tk), lambda i, j, k: (i, k)),   # x tile
        pl.BlockSpec((tk, tn), lambda i, j, k: (k, j)),   # weight (K, N) tile
        pl.BlockSpec((1, tn), lambda i, j, k: (0, j)),    # bias tile
    ]
    out_spec = pl.BlockSpec((tm, tn), lambda i, j, k: (i, j))

    if grid_k == 1:
        kernel = _kernel_single_k
        scratch = []
    elif jnp.dtype(out_dtype) == jnp.float32:
        kernel = _kernel_multi_k_f32out
        scratch = []
    else:
        kernel = _kernel_multi_k_acc
        scratch = [pltpu.VMEM((tm, tn), jnp.float32)]

    # Double-buffered inputs + resident output (+ optional scratch).
    ws_bytes = (
        2 * (tm * tk * in_bytes + tk * tn * w_bytes + tn * out_bytes)
        + 2 * tm * tn * out_bytes
        + (tm * tn * 4 if scratch else 0)
    )
    vmem_limit = min(
        max(int(1.5 * ws_bytes) + (4 << 20), 32 << 20),
        int(0.9 * _vmem_capacity_bytes()),
    )

    cost = pl.CostEstimate(
        flops=2 * M * N * K,
        transcendentals=0,
        bytes_accessed=(
            Mp * Kp * in_bytes * grid_n      # x re-read once per N tile
            + Kp * Np * w_bytes * grid_m     # W re-read once per M tile
            + Np * out_bytes                 # bias
            + Mp * Np * out_bytes            # output
        ),
    )

    out2d = pl.pallas_call(
        kernel,
        out_shape=jax.ShapeDtypeStruct((Mp, Np), out_dtype),
        grid=grid,
        in_specs=in_specs,
        out_specs=out_spec,
        scratch_shapes=scratch,
        compiler_params=pltpu.CompilerParams(
            dimension_semantics=("parallel", "parallel", "arbitrary"),
            vmem_limit_bytes=vmem_limit,
        ),
        cost_estimate=cost,
    )(x2d, wt, b2d)

    if (Mp, Np) != (M, N):
        out2d = out2d[:M, :N]
    return out2d.reshape(*lead, N)


def ga_linear(x, weight, bias=None, *, tile_caps=None):
    """F.linear(x, weight, bias) with weight in nn.Linear (out, in) layout.
    Prefer prepare_ga_linear_weight() + ga_linear_kn() so the transpose is
    paid once at init rather than on every forward call."""
    return ga_linear_kn(
        x, prepare_ga_linear_weight(weight), bias, tile_caps=tile_caps
    )


def init_ga_linear_params(key, in_features, out_features, dtype=jnp.float32):
    """Deterministic re-implementation of GALinear.reset_parameters()."""
    kw, kb = jax.random.split(key)
    # kaiming_uniform_(weight, a=sqrt(5)) -> U(-1/sqrt(fan_in), 1/sqrt(fan_in))
    fan_in = in_features
    w_bound = math.sqrt(1.0 / fan_in)
    weight = jax.random.uniform(
        kw, (out_features, in_features), dtype=dtype,
        minval=-w_bound, maxval=w_bound)
    b_bound = 1.0 / math.sqrt(fan_in)
    bias = jax.random.uniform(
        kb, (out_features,), dtype=dtype, minval=-b_bound, maxval=b_bound)
    return weight, bias


if __name__ == "__main__":
    key = jax.random.PRNGKey(0)
    k_x, k_p, k_x2, k_p2, k_x3, k_p3 = jax.random.split(key, 6)

    # --- small case: single full-extent tile, single K step, bias fused ---
    B, S, in_f, out_f = 2, 8, 32, 32
    x = jax.random.normal(k_x, (B, S, in_f), dtype=jnp.float32)
    weight, bias = init_ga_linear_params(k_p, in_f, out_f)
    wt = prepare_ga_linear_weight(weight)   # (K, N) layout, done once at init

    fwd = jax.jit(ga_linear_kn)
    y = jax.block_until_ready(fwd(x, wt, bias))
    y_ref = jnp.einsum("bsk,nk->bsn", x, weight) + bias
    assert y.shape == (B, S, out_f)
    assert jnp.allclose(y, y_ref, atol=2e-3, rtol=2e-3)

    # --- multi-tile f32 case: small shapes, tile caps forced down so the
    #     (M, N, K) grid, K-resident accumulation into o_ref, ragged M and
    #     K zero-padding paths are all exercised ---
    B2, S2, in2, out2 = 2, 20, 320, 256     # M = 40
    x2 = jax.random.normal(k_x2, (B2, S2, in2), dtype=jnp.float32)
    w2, b2 = init_ga_linear_params(k_p2, in2, out2)
    wt2 = prepare_ga_linear_weight(w2)

    y2 = jax.block_until_ready(
        ga_linear_kn(x2, wt2, b2, tile_caps=(16, 128, 128)))
    y2_ref = jnp.einsum("bsk,nk->bsn", x2, w2) + b2
    assert y2.shape == (B2, S2, out2)
    assert jnp.allclose(y2, y2_ref, atol=2e-3, rtol=2e-3)

    # --- bf16 case: exercises the f32 scratch-accumulator kernel path ---
    B3, S3, in3, out3 = 2, 16, 256, 128
    x3 = jax.random.normal(k_x3, (B3, S3, in3), dtype=jnp.bfloat16)
    w3, b3 = init_ga_linear_params(k_p3, in3, out3, dtype=jnp.bfloat16)
    wt3 = prepare_ga_linear_weight(w3)

    y3 = jax.block_until_ready(
        ga_linear_kn(x3, wt3, b3, tile_caps=(32, 128, 128)))
    y3_ref = (jnp.einsum("bsk,nk->bsn",
                         x3.astype(jnp.float32), w3.astype(jnp.float32))
              + b3.astype(jnp.float32))
    assert y3.shape == (B3, S3, out3)
    assert jnp.allclose(y3.astype(jnp.float32), y3_ref, atol=3e-2, rtol=3e-2)

    # TODO(synk): the gradient-analysis statistics (sum_i_gij, norm_l2sq_gi,
    # etc.) live in GALinearFunction.backward and are not part of the forward
    # semantics implemented here.
    print("KERNEL_OK")
</pallas_src>

<mosaic_0001>
module attributes {stable_mosaic.version = 11 : i64} {
  func.func @_kernel_single_k(%arg0: i32, %arg1: i32, %arg2: i32, %arg3: memref<16x32xf32, #tpu.memory_space<vmem>>, %arg4: memref<32x32xf32, #tpu.memory_space<vmem>>, %arg5: memref<1x32xf32, #tpu.memory_space<vmem>>, %arg6: memref<16x32xf32, #tpu.memory_space<vmem>>) attributes {dimension_semantics = [#tpu.dimension_semantics<parallel>, #tpu.dimension_semantics<parallel>, #tpu.dimension_semantics<arbitrary>], iteration_bounds = array<i64: 1, 1, 1>, scalar_prefetch = 0 : i64, scratch_operands = 0 : i64, tpu.core_type = #tpu.core_type<tc>, window_params = [{transform_indices = @transform_0, window_bounds = array<i64: 16, 32>}, {transform_indices = @transform_1, window_bounds = array<i64: 32, 32>}, {transform_indices = @transform_2, window_bounds = array<i64: 1, 32>}, {transform_indices = @transform_3, window_bounds = array<i64: 16, 32>}]} {
    %c0 = arith.constant 0 : index
    %c0_0 = arith.constant 0 : index
    %0 = vector.load %arg3[%c0, %c0_0] : memref<16x32xf32, #tpu.memory_space<vmem>>, vector<16x32xf32>
    %c0_1 = arith.constant 0 : index
    %c0_2 = arith.constant 0 : index
    %1 = vector.load %arg4[%c0_1, %c0_2] : memref<32x32xf32, #tpu.memory_space<vmem>>, vector<32x32xf32>
    %cst = arith.constant dense<0.000000e+00> : vector<16x32xf32>
    %2 = tpu.matmul %0, %1, %cst {dimension_numbers = #tpu.dot_dimension_numbers<[1], [0], [0], [1], [0, 0, 1, 1], [], []>} : vector<16x32xf32>, vector<32x32xf32>, vector<16x32xf32> -> vector<16x32xf32>
    %c0_3 = arith.constant 0 : index
    %c0_4 = arith.constant 0 : index
    %3 = vector.load %arg5[%c0_3, %c0_4] : memref<1x32xf32, #tpu.memory_space<vmem>>, vector<1x32xf32>
    %4 = vector.broadcast %3 : vector<1x32xf32> to vector<16x32xf32>
    %5 = arith.addf %2, %4 : vector<16x32xf32>
    %c0_5 = arith.constant 0 : index
    %c0_6 = arith.constant 0 : index
    %6 = vector.load %arg6[%c0_5, %c0_6] : memref<16x32xf32, #tpu.memory_space<vmem>>, vector<16x32xf32>
    tpu.vector_store %arg6[%c0_5, %c0_6], %5 {strides = array<i32>} : memref<16x32xf32, #tpu.memory_space<vmem>>, vector<16x32xf32>,
    return
  }
  func.func @transform_0(%arg0: i32, %arg1: i32, %arg2: i32) -> (i32, i32) {
    %c0_i32 = arith.constant 0 : i32
    return %arg0, %arg2 : i32, i32
  }
  func.func @transform_1(%arg0: i32, %arg1: i32, %arg2: i32) -> (i32, i32) {
    %c0_i32 = arith.constant 0 : i32
    return %arg2, %arg1 : i32, i32
  }
  func.func @transform_2(%arg0: i32, %arg1: i32, %arg2: i32) -> (i32, i32) {
    %c0_i32 = arith.constant 0 : i32
    %c0_i32_0 = arith.constant 0 : i32
    return %c0_i32, %arg1 : i32, i32
  }
  func.func @transform_3(%arg0: i32, %arg1: i32, %arg2: i32) -> (i32, i32) {
    %c0_i32 = arith.constant 0 : i32
    return %arg0, %arg1 : i32, i32
  }
}

</mosaic_0001>

<bundles_post_ra>
// kernel: ga_linear_kn.1
= control target key start
LH: loop header
LB: loop body
LE: loop exit
PB: predicated region body
PF: predicated region fallthrough
CT: control target
= control target key end

     0   :  { %8 = vsyncpa [#allocation3], 0  ;;  %s249_s0 = inlined_call_operand.hbm [shape: f32[16,32], index: 0, kind: input, shape index: {}]   ;;  %s250_s1 = inlined_call_operand.hbm [shape: f32[32,32], index: 1, kind: input, shape index: {}]   ;;  %s251_s2 = inlined_call_operand.vmem [shape: f32[1,32], index: 2, kind: input, shape index: {}]   ;;  %s252_s3 = inlined_call_operand.hbm [shape: f32[16,32], index: 3, kind: output, shape index: {}]  }
   0x1   :  { %9 = vsyncpa [#allocation6], 0 }
   0x2   :  { %10 = vsyncpa [#allocation4], 0  ;;  %s15_s14 = sshll.u32 %s249_s0, 4  ;;  %s199_s15 = smov [#allocation2]   ;;  %s16_s14 = int_to_ptr.hbm [resolvable:$true] %s15_s14 }
   0x3   :  { %s17_s16 = sshll.u32 %s199_s15, 4  ;;  %s28_s19 = sshll.u32 %s250_s1, 4  ;;  %s18_s16 = int_to_ptr.vmem [resolvable:$true] %s17_s16  ;;  %s29_s19 = int_to_ptr.hbm [resolvable:$true] %s28_s19 }
   0x4   :  { %s200_s20 = smov 128   ;;  %s201_s21 = smov 8  }
   0x5   :  { %23 = dma.hbm_to_vmem [thread:$0]  %s16_s14, 256, %s18_s16, [#allocation3], %s200_s20, %s200_s20, %s201_s21  }
   0x6   :  { %s202_s22 = smov [#allocation5]  }
   0x7   :  { %s30_s23 = sshll.u32 %s202_s22, 4  ;;  %s31_s23 = int_to_ptr.vmem [resolvable:$true] %s30_s23 }
   0x8   :  { %36 = dma.hbm_to_vmem [thread:$0]  %s29_s19, 512, %s31_s23, [#allocation6], %s200_s20, %s200_s20, %s201_s21  }
   0x9   :  { %193 = dma.done.wait [#allocation3], 256  }
   0xa   :  { %194 = vsyncadd [#allocation3], 4294967040 }
   0xb   :  { %195 = dma.done.wait [#allocation6], 512  }
   0xc   :  { %196 = vsyncadd [#allocation6], 4294966784  ;;  %v52_v0 = vld [vmem:[#allocation5 + $0x18] sm:$0xff]  ;;  %v51_v1 = vld [vmem:[#allocation5 + $0x10] sm:$0xff]  ;;  %vm57_vm0 = vcmask 261120   ;;  %s203_s24 = smov [#allocation7]  }
   0xd   :  { %76 = vmatpush.msra.mxu0 %v52_v0  ;;  %111 = vmatpush.msra.mxu1 %v52_v0  ;;  %v50_v2 = vld [vmem:[#allocation5 + $0x8] sm:$0xff]  ;;  %v49_v3 = vld [vmem:[#allocation5] sm:$0xff]  ;;  %v47_v4 = vld [vmem:[#allocation2] sm:$0xff]  ;;  %s93_s25 = sshll.u32 %s203_s24, 4  ;;  %s95_s28 = sshll.u32 %s252_s3, 4  ;;  %s94_s25 = int_to_ptr.vmem [resolvable:$true] %s93_s25  ;;  %s96_s28 = int_to_ptr.hbm [resolvable:$true] %s95_s28 }
   0xe   :  { %v48_v5 = vld [vmem:[#allocation2 + $0x8] sm:$0xff]  ;;  %v120_v6 = vld [vmem:[%s251_s2] ss:$0 sm:$0xff] }
   0xf   :  { %77 = vmatpush.msra.mxu0 %v51_v1  ;;  %112 = vmatpush.msra.mxu1 %v51_v1 }
  0x11   :  { %78 = vmatpush.msra.mxu0 %v50_v2  ;;  %113 = vmatpush.msra.mxu1 %v50_v2 }
  0x13   :  { %79 = vmatpush.msra.mxu0 %v49_v3  ;;  %114 = vmatpush.msra.mxu1 %v49_v3 }
  0x14   :  { %109 = vmatmul.msk.f32.vlgmr.msra.gmra.mxu0 %vm57_vm0, %v47_v4  ;;  %110 = vmatmul.msk.f32.vlgmr.msra.gmra.mxu1 %vm57_vm0, %v48_v5 }
  0x91   :  { %v81_v7 = vpop.f32.mrf.mxu0  ;;  %v84_v8 = vpop.f32.mrf.mxu1 }
  0x92   :  { %v82_v9 = vadd.f32 %v120_v6, %v81_v7  ;;  %v85_v10 = vadd.f32 %v120_v6, %v84_v8 }
  0x94   :  { %87 = vst.msk [vmem:[#allocation7] sm:$0xff] %vm57_vm0, %v82_v9 }
  0x95   :  { %88 = vst.msk [vmem:[#allocation7 + $0x8] sm:$0xff] %vm57_vm0, %v85_v10 }
  0x96   :  { %101 = dma.vmem_to_hbm [thread:$0]  %s94_s25, 256, %s96_s28, [#allocation4], %s200_s20, %s200_s20, %s201_s21  }
  0x97   :  { %197 = dma.done.wait [#allocation4], 256  }
  0x98   :  { %198 = vsyncadd [#allocation4], 4294967040 }
  0x99   :  { %106 = vsyncpa [#allocation3], 1 }
  0x9a   :  { %107 = vsyncpa [#allocation6], 1 }
  0x9b   :  { %108 = vsyncpa [#allocation4], 1 }

</bundles_post_ra>
